<compile_context>
chip_gen: v7x
topology: tpu7x:2x2x1
jax: 0.10.0
libtpu: 0.0.40
codegen_flags: <defaults>
</compile_context>

<pallas_src>
import functools

import jax
import jax.numpy as jnp
import numpy as np
from jax import lax
from jax.experimental import pallas as pl
from jax.experimental.pallas import tpu as pltpu


def _score_graph_kernel(nv1_full_ref, nv2_full_ref, nv1_tile_ref, nv2_tile_ref,
                        w1t_ref, b1_ref, w2t_ref, b2_ref, out_ref,
                        *, alpha, k, n):
    # nv*_full_ref: (N, dim); nv*_tile_ref: (TM, dim)
    # w*t_ref: (1, dim, dim) already transposed to (in, out); b*_ref: (1, 1, dim)
    # out_ref: (1, TM, N)
    w1t = w1t_ref[0]            # (dim, dim)
    w2t = w2t_ref[0]
    b1 = b1_ref[0]              # (1, dim)
    b2 = b2_ref[0]

    # Per-feature linears + tanh.  The full-N versions feed the "column" side
    # of the adjacency slab, the TM-row versions feed the "row" side.  The
    # tiny recompute across row tiles is negligible vs. the N^2 stage.
    vec1_full = jnp.tanh(alpha * (
        jnp.dot(nv1_full_ref[...], w1t, preferred_element_type=jnp.float32) + b1))
    vec2_full = jnp.tanh(alpha * (
        jnp.dot(nv2_full_ref[...], w2t, preferred_element_type=jnp.float32) + b2))
    vec1_tile = jnp.tanh(alpha * (
        jnp.dot(nv1_tile_ref[...], w1t, preferred_element_type=jnp.float32) + b1))
    vec2_tile = jnp.tanh(alpha * (
        jnp.dot(nv2_tile_ref[...], w2t, preferred_element_type=jnp.float32) + b2))

    # a[r, c] = vec1[r].vec2[c] - vec2[r].vec1[c], restricted to this row slab.
    dn = (((1,), (1,)), ((), ()))     # contract the dim axis of both operands
    a = (lax.dot_general(vec1_tile, vec2_full, dn,
                         preferred_element_type=jnp.float32)
         - lax.dot_general(vec2_tile, vec1_full, dn,
                           preferred_element_type=jnp.float32))       # (TM, N)
    adj0 = jnp.maximum(jnp.tanh(alpha * a), 0.0)                      # relu(tanh)

    tm = adj0.shape[0]
    col = lax.broadcasted_iota(jnp.int32, (tm, n), 1)

    # Exact per-row top-k: k iterations of "row max with lowest-column-index
    # tie-break".  Keeps exactly k entries per row (same as torch.topk /
    # lax.top_k, including exact 1.0 ties from tanh saturation).  The kept
    # values are accumulated directly into `res`, so no mask / final where.
    work = adj0
    res = jnp.zeros_like(adj0)
    for _ in range(k):                     # k is small & static
        row_max = jnp.max(work, axis=1, keepdims=True)
        is_max = work == row_max
        sel_col = jnp.min(jnp.where(is_max, col, n), axis=1, keepdims=True)
        sel = col == sel_col
        res = res + jnp.where(sel, adj0, 0.0)
        work = jnp.where(sel, -jnp.inf, work)

    out_ref[0] = res


def score_graph_pallas(nodevec1, nodevec2, w1, b1, w2, b2, *, alpha, k,
                       tile_rows=256):
    """Returns adj stacked as (f_num, N, N) float32."""
    n, dim = nodevec1.shape
    f_num = w1.shape[0]

    # Row-tile size: whole problem if small, otherwise a capped row slab.
    tm = n if n <= tile_rows else tile_rows
    grid_r = pl.cdiv(n, tm)

    # Pre-transpose weights host-side: nn.Linear stores W[out, in]; the kernel
    # wants (in, out) so the contraction needs no in-kernel transpose.
    w1t = jnp.transpose(w1, (0, 2, 1))          # (f_num, dim, dim)
    w2t = jnp.transpose(w2, (0, 2, 1))
    b1r = b1.reshape(f_num, 1, dim)
    b2r = b2.reshape(f_num, 1, dim)

    kernel = functools.partial(_score_graph_kernel, alpha=alpha, k=k, n=n)

    # Honest cost estimate for the tiled schedule.
    flops_linear = f_num * grid_r * (2 * 2 * n * dim * dim
                                     + 2 * 2 * tm * dim * dim)
    flops_gram = f_num * 2 * (2 * n * n * dim)
    flops = flops_linear + flops_gram
    transcendentals = f_num * grid_r * 2 * (n + tm) * dim + f_num * n * n
    bytes_accessed = 4 * (f_num * grid_r * (2 * n * dim + 2 * tm * dim
                                            + 2 * dim * dim + 2 * dim)
                          + f_num * n * n)

    return pl.pallas_call(
        kernel,
        out_shape=jax.ShapeDtypeStruct((f_num, n, n), jnp.float32),
        grid=(f_num, grid_r),
        in_specs=[
            pl.BlockSpec((n, dim), lambda f, r: (0, 0)),          # nodevec1 (full)
            pl.BlockSpec((n, dim), lambda f, r: (0, 0)),          # nodevec2 (full)
            pl.BlockSpec((tm, dim), lambda f, r: (r, 0)),         # nodevec1 row tile
            pl.BlockSpec((tm, dim), lambda f, r: (r, 0)),         # nodevec2 row tile
            pl.BlockSpec((1, dim, dim), lambda f, r: (f, 0, 0)),  # W1.T per feature
            pl.BlockSpec((1, 1, dim), lambda f, r: (f, 0, 0)),    # b1 per feature
            pl.BlockSpec((1, dim, dim), lambda f, r: (f, 0, 0)),  # W2.T per feature
            pl.BlockSpec((1, 1, dim), lambda f, r: (f, 0, 0)),    # b2 per feature
        ],
        out_specs=pl.BlockSpec((1, tm, n), lambda f, r: (f, r, 0)),
        compiler_params=pltpu.CompilerParams(
            dimension_semantics=("parallel", "parallel")),
        cost_estimate=pl.CostEstimate(
            flops=flops, transcendentals=transcendentals,
            bytes_accessed=bytes_accessed),
    )(nodevec1, nodevec2, nodevec1, nodevec2, w1t, b1r, w2t, b2r)


def score_graph_reference(nodevec1, nodevec2, w1, b1, w2, b2, *, alpha, k):
    """Pure-JAX reference mirroring the PyTorch forward (topk + scatter)."""
    f_num = w1.shape[0]
    n = nodevec1.shape[0]
    outs = []
    for i in range(f_num):
        vec1 = jnp.tanh(alpha * (nodevec1 @ w1[i].T + b1[i]))
        vec2 = jnp.tanh(alpha * (nodevec2 @ w2[i].T + b2[i]))
        a = vec1 @ vec2.T - vec2 @ vec1.T
        adj0 = jax.nn.relu(jnp.tanh(alpha * a))
        _, ind = lax.top_k(adj0, k)
        mask = jnp.zeros((n, n), jnp.float32).at[
            jnp.arange(n)[:, None], ind].set(1.0)
        outs.append(adj0 * mask)
    return jnp.stack(outs, axis=0)


if __name__ == "__main__":
    # Small, module-consistent sizes.
    nodes = 16     # embedding table size
    dim = 32       # embedding / linear dim
    f_num = 2      # number of feature graphs
    k = 3          # top-k per row
    alpha = 3.0
    n = 8          # number of nodes actually selected by idx

    key = jax.random.PRNGKey(0)
    k_e1, k_e2, k_w1, k_b1, k_w2, k_b2 = jax.random.split(key, 6)

    # Deterministic parameter init (nn.Embedding ~ N(0,1); nn.Linear ~ U(+-1/sqrt(in))).
    emb1 = jax.random.normal(k_e1, (nodes, dim), jnp.float32)
    emb2 = jax.random.normal(k_e2, (nodes, dim), jnp.float32)
    bound = 1.0 / jnp.sqrt(dim)
    w1 = jax.random.uniform(k_w1, (f_num, dim, dim), jnp.float32, -bound, bound)
    b1 = jax.random.uniform(k_b1, (f_num, dim), jnp.float32, -bound, bound)
    w2 = jax.random.uniform(k_w2, (f_num, dim, dim), jnp.float32, -bound, bound)
    b2 = jax.random.uniform(k_b2, (f_num, dim), jnp.float32, -bound, bound)

    idx = jnp.arange(n, dtype=jnp.int32)
    # Embedding lookup (plain-JAX glue, outside the kernel).
    nodevec1 = emb1[idx]
    nodevec2 = emb2[idx]

    adj = score_graph_pallas(nodevec1, nodevec2, w1, b1, w2, b2,
                             alpha=alpha, k=k)
    adj = jax.block_until_ready(adj)

    adj_ref = score_graph_reference(nodevec1, nodevec2, w1, b1, w2, b2,
                                    alpha=alpha, k=k)
    np.testing.assert_allclose(np.asarray(adj), np.asarray(adj_ref),
                               rtol=1e-5, atol=1e-5)

    # adj_set equivalent: list of (N, N) matrices, one per feature.
    adj_set = [adj[i] for i in range(f_num)]
    assert len(adj_set) == f_num and adj_set[0].shape == (n, n)

    print("KERNEL_OK")
</pallas_src>

<mosaic_0001>
module attributes {stable_mosaic.version = 11 : i64} {
  func.func @_score_graph_kernel(%arg0: i32, %arg1: i32, %arg2: memref<8x32xf32, #tpu.memory_space<vmem>>, %arg3: memref<8x32xf32, #tpu.memory_space<vmem>>, %arg4: memref<8x32xf32, #tpu.memory_space<vmem>>, %arg5: memref<8x32xf32, #tpu.memory_space<vmem>>, %arg6: memref<1x32x32xf32, #tpu.memory_space<vmem>>, %arg7: memref<1x1x32xf32, #tpu.memory_space<vmem>>, %arg8: memref<1x32x32xf32, #tpu.memory_space<vmem>>, %arg9: memref<1x1x32xf32, #tpu.memory_space<vmem>>, %arg10: memref<1x8x8xf32, #tpu.memory_space<vmem>>) attributes {dimension_semantics = [#tpu.dimension_semantics<parallel>, #tpu.dimension_semantics<parallel>], iteration_bounds = array<i64: 2, 1>, scalar_prefetch = 0 : i64, scratch_operands = 0 : i64, tpu.core_type = #tpu.core_type<tc>, window_params = [{pipeline_mode = #tpu.pipeline_mode<synchronous>, transform_indices = @transform_0, window_bounds = array<i64: 8, 32>}, {pipeline_mode = #tpu.pipeline_mode<synchronous>, transform_indices = @transform_1, window_bounds = array<i64: 8, 32>}, {transform_indices = @transform_2, window_bounds = array<i64: 8, 32>}, {transform_indices = @transform_3, window_bounds = array<i64: 8, 32>}, {transform_indices = @transform_4, window_bounds = array<i64: 1, 32, 32>}, {transform_indices = @transform_5, window_bounds = array<i64: 1, 1, 32>}, {transform_indices = @transform_6, window_bounds = array<i64: 1, 32, 32>}, {transform_indices = @transform_7, window_bounds = array<i64: 1, 1, 32>}, {transform_indices = @transform_8, window_bounds = array<i64: 1, 8, 8>}]} {
    %c0 = arith.constant 0 : index
    %c0_0 = arith.constant 0 : index
    %c0_1 = arith.constant 0 : index
    %0 = vector.load %arg6[%c0, %c0_0, %c0_1] : memref<1x32x32xf32, #tpu.memory_space<vmem>>, vector<1x32x32xf32>
    %1 = vector.shape_cast %0 : vector<1x32x32xf32> to vector<32x32xf32>
    %c0_2 = arith.constant 0 : index
    %c0_3 = arith.constant 0 : index
    %c0_4 = arith.constant 0 : index
    %2 = vector.load %arg8[%c0_2, %c0_3, %c0_4] : memref<1x32x32xf32, #tpu.memory_space<vmem>>, vector<1x32x32xf32>
    %3 = vector.shape_cast %2 : vector<1x32x32xf32> to vector<32x32xf32>
    %c0_5 = arith.constant 0 : index
    %c0_6 = arith.constant 0 : index
    %c0_7 = arith.constant 0 : index
    %4 = vector.load %arg7[%c0_5, %c0_6, %c0_7] : memref<1x1x32xf32, #tpu.memory_space<vmem>>, vector<1x1x32xf32>
    %5 = vector.shape_cast %4 : vector<1x1x32xf32> to vector<1x32xf32>
    %c0_8 = arith.constant 0 : index
    %c0_9 = arith.constant 0 : index
    %c0_10 = arith.constant 0 : index
    %6 = vector.load %arg9[%c0_8, %c0_9, %c0_10] : memref<1x1x32xf32, #tpu.memory_space<vmem>>, vector<1x1x32xf32>
    %7 = vector.shape_cast %6 : vector<1x1x32xf32> to vector<1x32xf32>
    %c0_11 = arith.constant 0 : index
    %c0_12 = arith.constant 0 : index
    %8 = vector.load %arg2[%c0_11, %c0_12] : memref<8x32xf32, #tpu.memory_space<vmem>>, vector<8x32xf32>
    %cst = arith.constant dense<0.000000e+00> : vector<8x32xf32>
    %9 = tpu.matmul %8, %1, %cst {dimension_numbers = #tpu.dot_dimension_numbers<[1], [0], [0], [1], [0, 0, 1, 1], [], []>} : vector<8x32xf32>, vector<32x32xf32>, vector<8x32xf32> -> vector<8x32xf32>
    %10 = vector.broadcast %5 : vector<1x32xf32> to vector<8x32xf32>
    %11 = arith.addf %9, %10 : vector<8x32xf32>
    %cst_13 = arith.constant 3.000000e+00 : f32
    %12 = vector.broadcast %cst_13 : f32 to vector<8x32xf32>
    %13 = arith.mulf %12, %11 : vector<8x32xf32>
    %14 = math.tanh %13 : vector<8x32xf32>
    %c0_14 = arith.constant 0 : index
    %c0_15 = arith.constant 0 : index
    %15 = vector.load %arg3[%c0_14, %c0_15] : memref<8x32xf32, #tpu.memory_space<vmem>>, vector<8x32xf32>
    %cst_16 = arith.constant dense<0.000000e+00> : vector<8x32xf32>
    %16 = tpu.matmul %15, %3, %cst_16 {dimension_numbers = #tpu.dot_dimension_numbers<[1], [0], [0], [1], [0, 0, 1, 1], [], []>} : vector<8x32xf32>, vector<32x32xf32>, vector<8x32xf32> -> vector<8x32xf32>
    %17 = vector.broadcast %7 : vector<1x32xf32> to vector<8x32xf32>
    %18 = arith.addf %16, %17 : vector<8x32xf32>
    %cst_17 = arith.constant 3.000000e+00 : f32
    %19 = vector.broadcast %cst_17 : f32 to vector<8x32xf32>
    %20 = arith.mulf %19, %18 : vector<8x32xf32>
    %21 = math.tanh %20 : vector<8x32xf32>
    %c0_18 = arith.constant 0 : index
    %c0_19 = arith.constant 0 : index
    %22 = vector.load %arg4[%c0_18, %c0_19] : memref<8x32xf32, #tpu.memory_space<vmem>>, vector<8x32xf32>
    %cst_20 = arith.constant dense<0.000000e+00> : vector<8x32xf32>
    %23 = tpu.matmul %22, %1, %cst_20 {dimension_numbers = #tpu.dot_dimension_numbers<[1], [0], [0], [1], [0, 0, 1, 1], [], []>} : vector<8x32xf32>, vector<32x32xf32>, vector<8x32xf32> -> vector<8x32xf32>
    %24 = vector.broadcast %5 : vector<1x32xf32> to vector<8x32xf32>
    %25 = arith.addf %23, %24 : vector<8x32xf32>
    %cst_21 = arith.constant 3.000000e+00 : f32
    %26 = vector.broadcast %cst_21 : f32 to vector<8x32xf32>
    %27 = arith.mulf %26, %25 : vector<8x32xf32>
    %28 = math.tanh %27 : vector<8x32xf32>
    %c0_22 = arith.constant 0 : index
    %c0_23 = arith.constant 0 : index
    %29 = vector.load %arg5[%c0_22, %c0_23] : memref<8x32xf32, #tpu.memory_space<vmem>>, vector<8x32xf32>
    %cst_24 = arith.constant dense<0.000000e+00> : vector<8x32xf32>
    %30 = tpu.matmul %29, %3, %cst_24 {dimension_numbers = #tpu.dot_dimension_numbers<[1], [0], [0], [1], [0, 0, 1, 1], [], []>} : vector<8x32xf32>, vector<32x32xf32>, vector<8x32xf32> -> vector<8x32xf32>
    %31 = vector.broadcast %7 : vector<1x32xf32> to vector<8x32xf32>
    %32 = arith.addf %30, %31 : vector<8x32xf32>
    %cst_25 = arith.constant 3.000000e+00 : f32
    %33 = vector.broadcast %cst_25 : f32 to vector<8x32xf32>
    %34 = arith.mulf %33, %32 : vector<8x32xf32>
    %35 = math.tanh %34 : vector<8x32xf32>
    %cst_26 = arith.constant dense<0.000000e+00> : vector<8x8xf32>
    %36 = tpu.matmul %28, %21, %cst_26 {dimension_numbers = #tpu.dot_dimension_numbers<[1], [1], [0], [0], [0, 0, 1, 0], [], []>} : vector<8x32xf32>, vector<8x32xf32>, vector<8x8xf32> -> vector<8x8xf32>
    %cst_27 = arith.constant dense<0.000000e+00> : vector<8x8xf32>
    %37 = tpu.matmul %35, %14, %cst_27 {dimension_numbers = #tpu.dot_dimension_numbers<[1], [1], [0], [0], [0, 0, 1, 0], [], []>} : vector<8x32xf32>, vector<8x32xf32>, vector<8x8xf32> -> vector<8x8xf32>
    %38 = arith.subf %36, %37 : vector<8x8xf32>
    %cst_28 = arith.constant 3.000000e+00 : f32
    %39 = vector.broadcast %cst_28 : f32 to vector<8x8xf32>
    %40 = arith.mulf %39, %38 : vector<8x8xf32>
    %41 = math.tanh %40 : vector<8x8xf32>
    %cst_29 = arith.constant 0.000000e+00 : f32
    %42 = vector.broadcast %cst_29 : f32 to vector<8x8xf32>
    %43 = arith.maximumf %41, %42 : vector<8x8xf32>
    %44 = tpu.iota {dimensions = array<i32: 1>} : vector<8x8xi32>
    %cst_30 = arith.constant 0.000000e+00 : f32
    %45 = vector.broadcast %cst_30 : f32 to vector<8x8xf32>
    %cst_31 = arith.constant dense<0xFF800000> : vector<8xf32>
    %46 = vector.multi_reduction <maximumf>, %43, %cst_31 [1] : vector<8x8xf32> to vector<8xf32>
    %47 = vector.shape_cast %46 : vector<8xf32> to vector<8x1xf32>
    %48 = vector.broadcast %47 : vector<8x1xf32> to vector<8x8xf32>
    %49 = arith.cmpf oeq, %43, %48 : vector<8x8xf32>
    %c8_i32 = arith.constant 8 : i32
    %50 = vector.broadcast %c8_i32 : i32 to vector<8x8xi32>
    %51 = arith.select %49, %44, %50 : vector<8x8xi1>, vector<8x8xi32>
    %cst_32 = arith.constant dense<2147483647> : vector<8xi32>
    %52 = vector.multi_reduction <minsi>, %51, %cst_32 [1] : vector<8x8xi32> to vector<8xi32>
    %53 = vector.shape_cast %52 : vector<8xi32> to vector<8x1xi32>
    %54 = vector.broadcast %53 : vector<8x1xi32> to vector<8x8xi32>
    %55 = arith.cmpi eq, %44, %54 : vector<8x8xi32>
    %cst_33 = arith.constant 0.000000e+00 : f32
    %56 = vector.broadcast %cst_33 : f32 to vector<8x8xf32>
    %57 = arith.select %55, %43, %56 : vector<8x8xi1>, vector<8x8xf32>
    %58 = arith.addf %45, %57 : vector<8x8xf32>
    %cst_34 = arith.constant 0xFF800000 : f32
    %59 = vector.broadcast %cst_34 : f32 to vector<8x8xf32>
    %60 = arith.select %55, %59, %43 : vector<8x8xi1>, vector<8x8xf32>
    %cst_35 = arith.constant dense<0xFF800000> : vector<8xf32>
    %61 = vector.multi_reduction <maximumf>, %60, %cst_35 [1] : vector<8x8xf32> to vector<8xf32>
    %62 = vector.shape_cast %61 : vector<8xf32> to vector<8x1xf32>
    %63 = vector.broadcast %62 : vector<8x1xf32> to vector<8x8xf32>
    %64 = arith.cmpf oeq, %60, %63 : vector<8x8xf32>
    %c8_i32_36 = arith.constant 8 : i32
    %65 = vector.broadcast %c8_i32_36 : i32 to vector<8x8xi32>
    %66 = arith.select %64, %44, %65 : vector<8x8xi1>, vector<8x8xi32>
    %cst_37 = arith.constant dense<2147483647> : vector<8xi32>
    %67 = vector.multi_reduction <minsi>, %66, %cst_37 [1] : vector<8x8xi32> to vector<8xi32>
    %68 = vector.shape_cast %67 : vector<8xi32> to vector<8x1xi32>
    %69 = vector.broadcast %68 : vector<8x1xi32> to vector<8x8xi32>
    %70 = arith.cmpi eq, %44, %69 : vector<8x8xi32>
    %cst_38 = arith.constant 0.000000e+00 : f32
    %71 = vector.broadcast %cst_38 : f32 to vector<8x8xf32>
    %72 = arith.select %70, %43, %71 : vector<8x8xi1>, vector<8x8xf32>
    %73 = arith.addf %58, %72 : vector<8x8xf32>
    %cst_39 = arith.constant 0xFF800000 : f32
    %74 = vector.broadcast %cst_39 : f32 to vector<8x8xf32>
    %75 = arith.select %70, %74, %60 : vector<8x8xi1>, vector<8x8xf32>
    %cst_40 = arith.constant dense<0xFF800000> : vector<8xf32>
    %76 = vector.multi_reduction <maximumf>, %75, %cst_40 [1] : vector<8x8xf32> to vector<8xf32>
    %77 = vector.shape_cast %76 : vector<8xf32> to vector<8x1xf32>
    %78 = vector.broadcast %77 : vector<8x1xf32> to vector<8x8xf32>
    %79 = arith.cmpf oeq, %75, %78 : vector<8x8xf32>
    %c8_i32_41 = arith.constant 8 : i32
    %80 = vector.broadcast %c8_i32_41 : i32 to vector<8x8xi32>
    %81 = arith.select %79, %44, %80 : vector<8x8xi1>, vector<8x8xi32>
    %cst_42 = arith.constant dense<2147483647> : vector<8xi32>
    %82 = vector.multi_reduction <minsi>, %81, %cst_42 [1] : vector<8x8xi32> to vector<8xi32>
    %83 = vector.shape_cast %82 : vector<8xi32> to vector<8x1xi32>
    %84 = vector.broadcast %83 : vector<8x1xi32> to vector<8x8xi32>
    %85 = arith.cmpi eq, %44, %84 : vector<8x8xi32>
    %cst_43 = arith.constant 0.000000e+00 : f32
    %86 = vector.broadcast %cst_43 : f32 to vector<8x8xf32>
    %87 = arith.select %85, %43, %86 : vector<8x8xi1>, vector<8x8xf32>
    %88 = arith.addf %73, %87 : vector<8x8xf32>
    %c0_44 = arith.constant 0 : index
    %c0_45 = arith.constant 0 : index
    %c0_46 = arith.constant 0 : index
    %89 = vector.load %arg10[%c0_44, %c0_45, %c0_46] : memref<1x8x8xf32, #tpu.memory_space<vmem>>, vector<1x8x8xf32>
    %90 = vector.shape_cast %89 : vector<1x8x8xf32> to vector<8x8xf32>
    %91 = vector.shape_cast %88 : vector<8x8xf32> to vector<1x8x8xf32>
    tpu.vector_store %arg10[%c0_44, %c0_45, %c0_46], %91 {strides = array<i32>} : memref<1x8x8xf32, #tpu.memory_space<vmem>>, vector<1x8x8xf32>,
    return
  }
  func.func @transform_0(%arg0: i32, %arg1: i32) -> (i32, i32) {
    %c0_i32 = arith.constant 0 : i32
    %c0_i32_0 = arith.constant 0 : i32
    %c0_i32_1 = arith.constant 0 : i32
    return %c0_i32, %c0_i32_0 : i32, i32
  }
  func.func @transform_1(%arg0: i32, %arg1: i32) -> (i32, i32) {
    %c0_i32 = arith.constant 0 : i32
    %c0_i32_0 = arith.constant 0 : i32
    %c0_i32_1 = arith.constant 0 : i32
    return %c0_i32, %c0_i32_0 : i32, i32
  }
  func.func @transform_2(%arg0: i32, %arg1: i32) -> (i32, i32) {
    %c0_i32 = arith.constant 0 : i32
    %c0_i32_0 = arith.constant 0 : i32
    return %arg1, %c0_i32 : i32, i32
  }
  func.func @transform_3(%arg0: i32, %arg1: i32) -> (i32, i32) {
    %c0_i32 = arith.constant 0 : i32
    %c0_i32_0 = arith.constant 0 : i32
    return %arg1, %c0_i32 : i32, i32
  }
  func.func @transform_4(%arg0: i32, %arg1: i32) -> (i32, i32, i32) {
    %c0_i32 = arith.constant 0 : i32
    %c0_i32_0 = arith.constant 0 : i32
    %c0_i32_1 = arith.constant 0 : i32
    return %arg0, %c0_i32, %c0_i32_0 : i32, i32, i32
  }
  func.func @transform_5(%arg0: i32, %arg1: i32) -> (i32, i32, i32) {
    %c0_i32 = arith.constant 0 : i32
    %c0_i32_0 = arith.constant 0 : i32
    %c0_i32_1 = arith.constant 0 : i32
    return %arg0, %c0_i32, %c0_i32_0 : i32, i32, i32
  }
  func.func @transform_6(%arg0: i32, %arg1: i32) -> (i32, i32, i32) {
    %c0_i32 = arith.constant 0 : i32
    %c0_i32_0 = arith.constant 0 : i32
    %c0_i32_1 = arith.constant 0 : i32
    return %arg0, %c0_i32, %c0_i32_0 : i32, i32, i32
  }
  func.func @transform_7(%arg0: i32, %arg1: i32) -> (i32, i32, i32) {
    %c0_i32 = arith.constant 0 : i32
    %c0_i32_0 = arith.constant 0 : i32
    %c0_i32_1 = arith.constant 0 : i32
    return %arg0, %c0_i32, %c0_i32_0 : i32, i32, i32
  }
  func.func @transform_8(%arg0: i32, %arg1: i32) -> (i32, i32, i32) {
    %c0_i32 = arith.constant 0 : i32
    %c0_i32_0 = arith.constant 0 : i32
    return %arg0, %arg1, %c0_i32 : i32, i32, i32
  }
}

</mosaic_0001>

<bundles_post_ra>
// kernel: tpu_custom_call.1
= control target key start
LH: loop header
LB: loop body
LE: loop exit
PB: predicated region body
PF: predicated region fallthrough
CT: control target
= control target key end

     0   :  { %s2116_s0 = inlined_call_operand.hbm [shape: f32[8,32], index: 0, kind: input, shape index: {}]   ;;  %s2117_s1 = inlined_call_operand.hbm [shape: f32[8,32], index: 1, kind: input, shape index: {}]   ;;  %s2118_s2 = inlined_call_operand.hbm [shape: f32[8,32], index: 2, kind: input, shape index: {}]   ;;  %s2119_s3 = inlined_call_operand.vmem [shape: f32[8,32], index: 3, kind: input, shape index: {}]   ;;  %s2120_s4 = inlined_call_operand.hbm [shape: f32[2,32,32], index: 4, kind: input, shape index: {}]   ;;  %s2121_s5 = inlined_call_operand.vmem [shape: f32[2,1,32], index: 5, kind: input, shape index: {}]   ;;  %s2122_s6 = inlined_call_operand.hbm [shape: f32[2,32,32], index: 6, kind: input, shape index: {}]   ;;  %s2123_s7 = inlined_call_operand.vmem [shape: f32[2,1,32], index: 7, kind: input, shape index: {}]   ;;  %s2124_s8 = inlined_call_operand.hbm [shape: f32[2,8,8], index: 8, kind: output, shape index: {}]  }
   0x1   :  { %2143 = sst [smem:[#allocation23_spill]] %s2117_s1 }
   0x2   :  { %2144 = sst [smem:[#allocation24_spill]] %s2120_s4 }
   0x3   :  { %2145 = sst [smem:[#allocation25_spill]] %s2121_s5 }
   0x4   :  { %2146 = sst [smem:[#allocation26_spill]] %s2123_s7 }
   0x5   :  { %2147 = sst [smem:[#allocation27_spill]] %s2124_s8 }
   0x6   :  { %13 = vsyncpa [#allocation3], 0 }
   0x7   :  { %14 = vsyncpa [#allocation6], 0 }
   0x8   :  { %15 = vsyncpa [#allocation9], 0 }
   0x9   :  { %17 = vsyncpa [#allocation9 + $0x1], 0 }
   0xa   :  { %18 = vsyncpa [#allocation4], 0 }
   0xb   :  { %20 = vsyncpa [#allocation4 + $0x1], 0  ;;  %s1747_s27 = smov 0   ;;  %s1749_s28 = smov 0  }
   0xc   :  { %s1751_s29 = smov 0   ;;  %s1753_s30 = smov 0  }
   0xd   :  { %s1755_s9 = smov 0   ;;  %s1757_s10 = smov 0  }
   0xe LB: > { %2148 = sst [smem:[#allocation16_spill]] %s1669_s27  ;;  %s1778_s11 = sadd.s32 4294967295, %s1689_s10   ;;  %s1689_s10 = sphi %s1757_s10, %s26_s10   ;;  %s1685_s9 = sphi %s1755_s9, %s2195_s9   ;;  %s1681_s30 = sphi %s1753_s30, %s2194_s30   ;;  %s1677_s29 = sphi %s1751_s29, %s2190_s29   ;;  %s1673_s28 = sphi %s1749_s28, %s2193_s28   ;;  %s1669_s27 = sphi %s1747_s27, %s2192_s27  }
   0xf   : > { %2149 = sst [smem:[#allocation17_spill]] %s1677_s29  ;;  %s1204_s12 = sadd.s32 4294967294, %s1689_s10  }
  0x10   : > { %2150 = sst [smem:[#allocation18_spill]] %s1689_s10  ;;  %p152_p0 = scmp.ne.s32.totalorder %s1673_s28, %s1669_s27 }
  0x11   : > { %p2125_p1 = scmp.eq.s32.totalorder %s1778_s11, 0  ;;  %p262_p3 = scmp.eq.s32.totalorder %s1204_s12, 1 }
  0x12   : > { %p1205_p5 = scmp.ge.s32.totalorder %s1689_s10, 1  ;;  %p269_p7 = scmp.lt.s32.totalorder %s1689_s10, 3 }
  0x13   : > { %p1787_p4 = por %p2125_p1, %p152_p0  ;;  %p1792_p6 = por %p262_p3, %p152_p0 }
  0x14   : > { %p1797_p8 = pnand %p1205_p5, %p269_p7  ;;  %s1691_s16 = smov [#allocation5]  }
  0x15   : > { %s2151_s13 = scalar_select %p1787_p4, 1, 0 }
  0x16   : > { %s2152_s14 = scalar_select %p1792_p6, 1, 0 }
  0x17   : > { %s2154_s15 = scalar_select %p1797_p8, 1, 0 }
  0x18   : > { %2153 = sst [smem:[#allocation19_spill]] %s2152_s14  ;;  %s293_s17 = sshll.u32 %s1691_s16, 4  ;;  %s294_s17 = int_to_ptr.vmem [resolvable:$true] %s293_s17 }
  0x19   : > { %p1360_p10 = pneg %p1797_p8  ;;  %s38_s19 = sadd.s32 1, %s1685_s9 }
  0x1a   : > { %p1812_p12 = scmp.ge.s32.totalorder %s38_s19, 2  ;;  %s2157_s1 = sld [smem:[#allocation23_spill]] }
  0x1b   : > { %p1806_p11 = pnand %p1360_p10, %p2125_p1 }
  0x1c   : > { %s2156_s21 = scalar_select %p1812_p12, 1, 0 }
  0x1d   : > { %s2155_s18 = scalar_select %p1806_p11, 1, 0 }
  0x1e   : > { %p1824_p0 = pneg %p1806_p11 }
  0x20   : > { %s1455_s24 = scalar_lea.hbm %s2157_s1, 128 }
  0x21   : > { %p1456_p13 = scmp.ne.s32.totalorder %s2157_s1, %s1455_s24  ;;  %p1462_p7 = scmp.lt.u32.totalorder %s1455_s24, %s2157_s1 }
  0x23   : > { %p1458_p3 = pnand %p1824_p0, %p1456_p13 }
  0x25   : > { %p1459_p5 = pneg %p1458_p3 }
  0x27   : > { %p1464_p10 = pnand %p1462_p7, %p1459_p5 }
  0x29   : > { %1467 = shalt.err (!%p1464_p10)
}
  0x2a   : > { %s1468_s22 = scalar_lea.vmem %s294_s17, 128  ;;  %p1476_p6 = scmp.lt.s32.totalorder %s294_s17, %s294_s17 }
  0x2b   : > { %p1469_p9 = scmp.ne.s32.totalorder %s294_s17, %s1468_s22  ;;  %p1477_p4 = scmp.lt.s32.totalorder %s1468_s22, %s1468_s22 }
  0x2d   : > { %p1471_p1 = pnand %p1469_p9, %p1824_p0  ;;  %p1478_p8 = por %p1477_p4, %p1476_p6 }
  0x2f   : > { %p1472_p2 = pneg %p1471_p1 }
  0x31   : > { %p1479_p12 = pnand %p1478_p8, %p1472_p2 }
  0x33   : > { %1482 = shalt.err (!%p1479_p12)
}
  0x34   : > { %1366 = dma.hbm_to_vmem [thread:$0]  (!%p1806_p11), %s2157_s1, 128, %s294_s17, [#allocation6]  }
  0x35   : > { %p2159_p1 = scmp.ne.s32.totalorder %s2156_s21, 0  ;;  %p146_p2 = scmp.ne.s32.totalorder %s1677_s29, %s1673_s28 }
  0x36   : > { %p147_p4 = scmp.eq.s32.totalorder %s1689_s10, 0  ;;  %p1384_p6 = scmp.lt.s32.totalorder %s1689_s10, 2 }
  0x37   : > { %s2197_s19 = smov (%p2159_p1, %s38_s19), 0  ;;  %p2161_p12 = scmp.eq.s32.totalorder %s1778_s11, 1 }
  0x38   : > { %2160 = sst [smem:[#allocation20_spill]] %s2197_s19  ;;  %s136_s20 = ssub.s32 %s1685_s9, %s2197_s19 }
  0x39   : > { %p137_p8 = scmp.eq.s32.totalorder %s136_s20, 0  ;;  %p148_p9 = por %p147_p4, %p146_p2 }
  0x3a   : > { %p1852_p13 = por %p2161_p12, %p146_p2  ;;  %s324_s26 = sand.u32 1, %s1689_s10  }
  0x3b   : > { %s2164_s16 = sadd.s32 1, %s1677_s29  ;;  %s326_s17 = sand.u32 1, %s1677_s29  }
  0x3c   : > { %s2162_s24 = scalar_select %p1852_p13, 1, 0 }
  0x3d   : > { %s1860_s22 = scalar_select %p137_p8, %s1677_s29, %s2164_s16  }
  0x3e   : > { %2163 = sst [smem:[#allocation21_spill]] %s2162_s24  ;;  %s1863_s21 = sshll.u32 %s326_s17, 5 }
  0x3f   : > { %2165 = sst [smem:[#allocation22_spill]] %s1860_s22  ;;  %s2131_s23 = sshll.u32 %s1685_s9, 9 }
  0x40   : > { %s2166_s4 = sld [smem:[#allocation24_spill]]  ;;  %s328_s19 = scalar_lea.vmem [#allocation8], %s1863_s21 }
  0x41   : > { %s335_s10 = sshll.u32 %s328_s19, 4  ;;  %p1874_p3 = pnand %p1384_p6, %p148_p9  ;;  %s1878_s10 = int_to_ptr.vmem [resolvable:$true] %s335_s10 }
  0x42   : > { %s1880_s17 = scalar_lea.sflag [#allocation9], %s324_s26 }
  0x43   : > { %p2142_p7 = pneg %p1874_p3 }
  0x46   : > { %s1871_s20 = scalar_lea.hbm %s2166_s4, %s2131_s23  ;;  %s1488_s25 = scalar_lea.hbm %s2166_s4, 1024 }
  0x47   : > { %s1483_s22 = scalar_lea.hbm %s1871_s20, 512  ;;  %p1489_p2 = scmp.lt.u32.totalorder %s1871_s20, %s2166_s4 }
  0x48   : > { %p1484_p5 = scmp.ne.s32.totalorder %s1871_s20, %s1483_s22  ;;  %p1490_p4 = scmp.lt.u32.totalorder %s1488_s25, %s1483_s22 }
  0x49   : > { %p1492_p8 = scmp.lt.u32.totalorder %s1483_s22, %s1871_s20 }
  0x4a   : > { %p1486_p10 = pnand %p2142_p7, %p1484_p5  ;;  %p1491_p6 = por %p1490_p4, %p1489_p2 }
  0x4c   : > { %p1487_p1 = pneg %p1486_p10  ;;  %p1493_p9 = por %p1492_p8, %p1491_p6 }
  0x4e   : > { %p1494_p12 = pnand %p1493_p9, %p1487_p1 }
  0x50   : > { %1497 = shalt.err (!%p1494_p12)
}
  0x51   : > { %s1498_s26 = scalar_lea.vmem %s1878_s10, 512  ;;  %s1692_s1 = smov [#allocation8]  }
  0x52   : > { %p1499_p5 = scmp.ne.s32.totalorder %s1878_s10, %s1498_s26  ;;  %s1503_s19 = sshll.u32 %s1692_s1, 4  ;;  %s1504_s19 = int_to_ptr.vmem [resolvable:$false] %s1503_s19 }
  0x53   : > { %s1505_s29 = scalar_lea.vmem %s1504_s19, 1024  ;;  %p1506_p11 = scmp.lt.s32.totalorder %s1878_s10, %s1504_s19 }
  0x54   : > { %p1501_p10 = pnand %p1499_p5, %p2142_p7  ;;  %p1507_p2 = scmp.lt.s32.totalorder %s1505_s29, %s1498_s26 }
  0x56   : > { %p1502_p13 = pneg %p1501_p10  ;;  %p1508_p4 = por %p1507_p2, %p1506_p11 }
  0x58   : > { %p1509_p6 = pnand %p1508_p4, %p1502_p13 }
  0x5a   : > { %1512 = shalt.err (!%p1509_p6)
}
  0x5b   : > { %s2141_s22 = smov 128   ;;  %s1694_s23 = smov 8  }
  0x5c   : > { %1373 = dma.hbm_to_vmem [thread:$0]  (!%p1874_p3), %s1871_s20, 512, %s1878_s10, %s1880_s17, %s2141_s22, %s2141_s22, %s1694_s23  }
  0x5d   : > { %s2168_s25 = sshll.u32 %s1685_s9, 9  ;;  %s355_s29 = scalar_lea.vmem [#allocation10], %s1863_s21 }
  0x5e   : > { %s1916_s19 = scalar_lea.hbm %s2122_s6, %s2168_s25  ;;  %s362_s4 = sshll.u32 %s355_s29, 4  ;;  %s1919_s4 = int_to_ptr.vmem [resolvable:$true] %s362_s4 }
  0x5f   : > { %s1695_s14 = smov [#allocation2]   ;;  %s1696_s8 = smov [#allocation7]  }
  0x60   : > { %s282_s27 = sshll.u32 %s1695_s14, 4  ;;  %s306_s24 = sshll.u32 %s1696_s8, 4  ;;  %s283_s27 = int_to_ptr.vmem [resolvable:$true] %s282_s27  ;;  %s1921_s24 = int_to_ptr.vmem [resolvable:$true] %s306_s24 }
  0x61   : > { %s1513_s10 = scalar_lea.hbm %s2116_s0, 128 }
  0x62   : > { %p1514_p11 = scmp.ne.s32.totalorder %s2116_s0, %s1513_s10  ;;  %p1520_p8 = scmp.lt.u32.totalorder %s1513_s10, %s2116_s0 }
  0x64   : > { %p1516_p13 = pnand %p1514_p11, %p1824_p0 }
  0x66   : > { %p1517_p1 = pneg %p1516_p13 }
  0x68   : > { %p1522_p9 = pnand %p1520_p8, %p1517_p1 }
  0x6a   : > { %1525 = shalt.err (!%p1522_p9)
}
  0x6b   : > { %s1526_s8 = scalar_lea.vmem %s283_s27, 128  ;;  %p1534_p2 = scmp.lt.s32.totalorder %s283_s27, %s283_s27 }
  0x6c   : > { %p1527_p12 = scmp.ne.s32.totalorder %s283_s27, %s1526_s8  ;;  %p1535_p4 = scmp.lt.s32.totalorder %s1526_s8, %s1526_s8 }
  0x6e   : > { %p1529_p5 = pnand %p1527_p12, %p1824_p0  ;;  %p1536_p6 = por %p1535_p4, %p1534_p2 }
  0x70   : > { %p1530_p10 = pneg %p1529_p5 }
  0x72   : > { %p1537_p7 = pnand %p1536_p6, %p1530_p10 }
  0x74   : > { %1540 = shalt.err (!%p1537_p7)
}
  0x75   : > { %p2169_p11 = scmp.ne.s32.totalorder %s2155_s18, 0  ;;  %s1541_s1 = scalar_lea.hbm %s2118_s2, 128 }
  0x76   : > { %p1542_p13 = scmp.ne.s32.totalorder %s2118_s2, %s1541_s1  ;;  %p1548_p7 = scmp.lt.u32.totalorder %s1541_s1, %s2118_s2 }
  0x77   : > { %1363 = dma.hbm_to_vmem [thread:$0]  (!%p2169_p11), %s2116_s0, 128, %s283_s27, [#allocation3]  }
  0x78   : > { %p1544_p1 = pnand %p1542_p13, %p1824_p0 }
  0x7a   : > { %p1545_p8 = pneg %p1544_p1 }
  0x7c   : > { %p1550_p9 = pnand %p1548_p7, %p1545_p8 }
  0x7e   : > { %1553 = shalt.err (!%p1550_p9)
}
  0x7f   : > { %s1554_s27 = scalar_lea.vmem %s1921_s24, 128  ;;  %p1562_p2 = scmp.lt.s32.totalorder %s1921_s24, %s1921_s24 }
  0x80   : > { %p1555_p12 = scmp.ne.s32.totalorder %s1921_s24, %s1554_s27  ;;  %p1563_p4 = scmp.lt.s32.totalorder %s1554_s27, %s1554_s27 }
  0x82   : > { %p1557_p5 = pnand %p1555_p12, %p1824_p0  ;;  %p1564_p6 = por %p1563_p4, %p1562_p2 }
  0x84   : > { %p1558_p10 = pneg %p1557_p5 }
  0x86   : > { %p1565_p13 = pnand %p1564_p6, %p1558_p10 }
  0x88   : > { %1568 = shalt.err (!%p1565_p13)
}
  0x89   : > { %1369 = dma.hbm_to_vmem [thread:$0]  (!%p2169_p11), %s2118_s2, 128, %s1921_s24, [#allocation6]  }
  0x8a   : > { %s1569_s12 = scalar_lea.hbm %s1916_s19, 512  ;;  %p2170_p1 = pneg %p1874_p3 }
  0x8b   : > { %p1570_p0 = scmp.ne.s32.totalorder %s1916_s19, %s1569_s12  ;;  %s1574_s18 = scalar_lea.hbm %s2122_s6, 1024 }
  0x8c   : > { %p1575_p9 = scmp.lt.u32.totalorder %s1916_s19, %s2122_s6  ;;  %p1576_p12 = scmp.lt.u32.totalorder %s1574_s18, %s1569_s12 }
  0x8d   : > { %p1572_p8 = pnand %p1570_p0, %p2170_p1  ;;  %p1578_p10 = scmp.lt.u32.totalorder %s1569_s12, %s1916_s19 }
  0x8e   : > { %p1577_p5 = por %p1576_p12, %p1575_p9 }
  0x8f   : > { %p1573_p7 = pneg %p1572_p8 }
  0x90   : > { %p1579_p2 = por %p1578_p10, %p1577_p5 }
  0x92   : > { %p1580_p4 = pnand %p1579_p2, %p1573_p7 }
  0x94   : > { %1583 = shalt.err (!%p1580_p4)
}
  0x95   : > { %s1584_s24 = scalar_lea.vmem %s1919_s4, 512  ;;  %p2171_p6 = pmov %p2170_p1 }
  0x96   : > { %p1585_p11 = scmp.ne.s32.totalorder %s1919_s4, %s1584_s24  ;;  %s1697_s22 = smov [#allocation10]  }
  0x97   : > { %s1589_s1 = sshll.u32 %s1697_s22, 4  ;;  %s1590_s1 = int_to_ptr.vmem [resolvable:$false] %s1589_s1 }
  0x98   : > { %p1587_p13 = pnand %p1585_p11, %p2171_p6  ;;  %s1591_s26 = scalar_lea.vmem %s1590_s1, 1024 }
  0x99   : > { %p1592_p1 = scmp.lt.s32.totalorder %s1919_s4, %s1590_s1  ;;  %p1593_p8 = scmp.lt.s32.totalorder %s1591_s26, %s1584_s24 }
  0x9a   : > { %p1588_p0 = pneg %p1587_p13 }
  0x9b   : > { %p1594_p9 = por %p1593_p8, %p1592_p1 }
  0x9d   : > { %p1595_p12 = pnand %p1594_p9, %p1588_p0 }
  0x9f   : > { %1598 = shalt.err (!%p1595_p12)
}
  0xa0   : > { %s2172_s29 = smov 128   ;;  %p2173_p7 = scmp.ne.s32.totalorder %s2154_s15, 0 }
  0xa1   : > { %1376 = dma.hbm_to_vmem [thread:$0]  (!%p1874_p3), %s1916_s19, 512, %s1919_s4, %s1880_s17, %s2172_s29, %s2172_s29, %s1694_s23  }
  0xa2   : > { %380 = sbr.rel (%p2173_p7) target bundleno = 1996 (0x7cc), region = 52  ;;  %p2174_p5 = scmp.eq.s32.totalorder (!%p2173_p7), %s1778_s11, 0 }
  0xa9   : > { %1652 = dma.done.wait (%p2174_p5), [#allocation3], 128   ;;  %p2175_p10 = pmov %p2174_p5 }
  0xaa   : > { %p2176_p2 = pmov %p2174_p5 }
  0xab   : > { %1654 = vsyncadd (%p2175_p10), [#allocation3], 4294967168 }
  0xac   : > { %1656 = dma.done.wait (%p2176_p2), [#allocation6], 256   ;;  %p2177_p4 = pmov %p2176_p2 }
  0xad   : > { %s394_s16 = sand.u32 1, %s1778_s11   ;;  %s2003_s4 = sand.u32 1, %s1673_s28  }
  0xae   : > { %1658 = vsyncadd (%p2177_p4), [#allocation6], 4294967040  ;;  %s1221_s15 = sshll.u32 %s2003_s4, 5  ;;  %s395_s17 = scalar_lea.sflag [#allocation9], %s394_s16 }
  0xaf   : > { %s398_s23 = scalar_lea.vmem [#allocation8], %s1221_s15  ;;  %p2178_p3 = scmp.ne.s32.totalorder %s2151_s13, 0 }
  0xb1   : > { %1660 = dma.done.wait (%p2178_p3), %s395_s17, 1024  }
  0xb2   : > { %1662 = vsyncadd (%p2178_p3), %s395_s17, 4294966272  ;;  %v1698_v0 = vmov 0.0|0.0   ;;  %vm1699_vm0 = vmmov 0   ;;  %v1700_v1 = vmov 0.0   ;;  %v465_v2 = vld [vmem:[%s398_s23] sm:$0xff]  ;;  %v466_v3 = vld [vmem:[%s398_s23 + $0x8] sm:$0xff]  ;;  %v948_v49 = vlaneseq }
  0xb3   : > { %1318 = vmatprep.subr.bf16.mxu0 %v1698_v0  ;;  %1324 = vmatprep.subr.bf16.mxu1 %v1698_v0  ;;  %s407_s11 = scalar_lea.vmem [#allocation10], %s1221_s15  ;;  %v1319_v5 = vpack.c.bf16 %v466_v3, %v465_v2  ;;  %v467_v7 = vld [vmem:[%s398_s23 + $0x10] sm:$0xff]  ;;  %v468_v8 = vld [vmem:[%s398_s23 + $0x18] sm:$0xff]  ;;  %v475_v14 = vld [vmem:[#allocation2] sm:$0xff]  ;;  %vm482_vm1 = vcmask 261120   ;;  %p459_p11 = scmp.lt.s32.totalorder %s1681_s30, 1 }
  0xb4   : > { %1272 = vmatprep.mubr.msk.f32.mxu0 %vm1699_vm0, %v1700_v1  ;;  %1283 = vmatprep.mubr.msk.f32.mxu1 %vm1699_vm0, %v1700_v1  ;;  %v469_v4 = vld [vmem:[%s407_s11] sm:$0xff]  ;;  %v470_v6 = vld [vmem:[%s407_s11 + $0x8] sm:$0xff]  ;;  %v471_v10 = vld [vmem:[%s407_s11 + $0x10] sm:$0xff]  ;;  %v1322_v12 = vpack.c.bf16 %v468_v8, %v467_v7  ;;  %s2179_s21 = sld [smem:[#allocation25_spill]]  ;;  %s2180_s5 = sld [smem:[#allocation26_spill]]  ;;  %vm950_vm2 = vcmask 64512  }
  0xb5   : > { %v1325_v9 = vpack.c.bf16 %v470_v6, %v469_v4  ;;  %v472_v11 = vld [vmem:[%s407_s11 + $0x18] sm:$0xff]  ;;  %1320 = vmatpush3.bf16.msra.mxu0 %v1319_v5  ;;  %v558_v15 = vld [vmem:[#allocation5] sm:$0xff]  ;;  %v716_v17 = vld [vmem:[%s2119_s3] sm:$0xff]  ;;  %s460_s10 = scalar_select %p459_p11, %s1681_s30, 1  ;;  %v2039_v50 = vand.u32 127, %v948_v49 }
  0xb6   : > { %1321 = vmatprep.subr.bf16.mxu0 %v1698_v0  ;;  %v1328_v13 = vpack.c.bf16 %v472_v11, %v471_v10  ;;  %v640_v16 = vld [vmem:[#allocation7] sm:$0xff]  ;;  %s1223_s7 = sshll.u32 %s2003_s4, 3  ;;  %s2181_s14 = sld [smem:[#allocation21_spill]] }
  0xb7   : > { %1326 = vmatpush3.bf16.msra.mxu1 %v1325_v9  ;;  %s1235_s24 = sshll.u32 %s1681_s30, 7  ;;  %s454_s22 = scalar_lea.vmem [#allocation11], %s1223_s7 }
  0xb8   : > { %1327 = vmatprep.subr.bf16.mxu1 %v1698_v0  ;;  %s1038_s1 = sshll.u32 %s454_s22, 4  ;;  %s2182_s16 = sld [smem:[#allocation27_spill]]  ;;  %s2068_s1 = int_to_ptr.vmem [resolvable:$true] %s1038_s1 }
  0xb9   : > { %1323 = vmatpush3.bf16.msra.mxu0 %v1322_v12  ;;  %s1024_s30 = scalar_lea.sflag [#allocation4], %s2003_s4  ;;  %s1599_s17 = scalar_lea.vmem %s2068_s1, 128 }
  0xba   : > { %1330 = vmatprep.subr.bf16.mxu0 %v1698_v0  ;;  %s461_s25 = scalar_lea.vmem %s2179_s21, %s460_s10  ;;  %s464_s18 = scalar_lea.vmem %s2180_s5, %s460_s10 }
  0xbb   : > { %1329 = vmatpush3.bf16.msra.mxu1 %v1328_v13  ;;  %v1224_v18 = vld [vmem:[%s461_s25] ss:$0 sm:$0xff]  ;;  %p1600_p6 = scmp.ne.s32.totalorder %s2068_s1, %s1599_s17  ;;  %s1701_s23 = smov [#allocation11]  }
  0xbc   : > { %1336 = vmatprep.subr.bf16.mxu1 %v1698_v0  ;;  %1273 = vmatmul.mubr.msk.f32.vlgmr.msra.gmra.mrb[0].mxu0 %vm482_vm1, %v475_v14  ;;  %v1226_v19 = vld [vmem:[%s464_s18] ss:$0 sm:$0xff]  ;;  %p2183_p13 = scmp.ne.s32.totalorder %s2181_s14, 0  ;;  %s1603_s11 = sshll.u32 %s1701_s23, 4  ;;  %s1604_s11 = int_to_ptr.vmem [resolvable:$false] %s1603_s11 }
  0xbd   : > { %1332 = vmatpush3.bf16.msra.mxu0 %v1319_v5  ;;  %1294 = vmatprep.mubr.msk.f32.mxu0 %vm1699_vm0, %v1700_v1  ;;  %s1605_s13 = scalar_lea.vmem %s1604_s11, 256  ;;  %p1606_p8 = scmp.lt.s32.totalorder %s2068_s1, %s1604_s11 }
  0xbe   : > { %1284 = vmatmul.mubr.msk.f32.vlgmr.msra.gmra.mrb[0].mxu1 %vm482_vm1, %v558_v15  ;;  %1333 = vmatprep.subr.bf16.mxu0 %v1698_v0  ;;  %s2066_s15 = scalar_lea.hbm %s2182_s16, %s1235_s24  ;;  %p1601_p0 = pnand %p1600_p6, %p2183_p13 }
  0xbf   : > { %1338 = vmatpush3.bf16.msra.mxu1 %v1325_v9  ;;  %1305 = vmatprep.mubr.msk.f32.mxu1 %vm1699_vm0, %v1700_v1  ;;  %p1607_p9 = scmp.lt.s32.totalorder %s1605_s13, %s1599_s17 }
  0xc0   : > { %1339 = vmatprep.subr.bf16.mxu1 %v1698_v0  ;;  %p1602_p1 = pneg %p1601_p0 }
  0xc1   : > { %1335 = vmatpush3.bf16.msra.mxu0 %v1322_v12  ;;  %p1608_p12 = por %p1607_p9, %p1606_p8 }
  0xc2   : > { %1308 = vmatprep.subr.mxu0 %v1700_v1 }
  0xc3   : > { %1341 = vmatpush3.bf16.msra.mxu1 %v1328_v13  ;;  %p1609_p7 = pnand %p1608_p12, %p1602_p1 }
  0xc4   : > { %1313 = vmatprep.subr.mxu1 %v1700_v1  ;;  %1295 = vmatmul.mubr.msk.f32.vlgmr.msra.gmra.mrb[2].mxu0 %vm482_vm1, %v640_v16 }
  0xc5   : > { %1310 = vmatprep.mubr.msk.f32.mxu0 %vm1699_vm0, %v1700_v1 }
  0xc6   : > { %1306 = vmatmul.mubr.msk.f32.vlgmr.msra.gmra.mrb[2].mxu1 %vm482_vm1, %v716_v17 }
  0xc7   : > { %1315 = vmatprep.mubr.msk.f32.mxu1 %vm1699_vm0, %v1700_v1 }
 0x18f   : > { %v552_v20 = vpop.f32.mrb[0].mxu0 }
 0x190   : > { %v553_v21 = vadd.f32 %v1224_v18, %v552_v20  ;;  %v1274_v23 = vpop.f32.mrb[1].mxu0 }
 0x191   : > { %v634_v22 = vpop.f32.mrb[0].mxu1 }
 0x192   : > { %v635_v24 = vadd.f32 %v1226_v19, %v634_v22  ;;  %v1285_v25 = vpop.f32.mrb[1].mxu1  ;;  %v556_v26 = vmul.f32 3.0, %v553_v21 }
 0x194   : > { %v638_v27 = vmul.f32 3.0, %v635_v24  ;;  %1445 = vtanh.f32 %v556_v26 }
 0x196   : > { %1447 = vtanh.f32 %v638_v27 }
 0x197   : > { %v710_v28 = vpop.f32.mrb[2].mxu0 }
 0x198   : > { %v711_v29 = vadd.f32 %v1224_v18, %v710_v28  ;;  %v1296_v31 = vpop.f32.mrb[3].mxu0 }
 0x199   : > { %v786_v30 = vpop.f32.mrb[2].mxu1 }
 0x19a   : > { %v787_v32 = vadd.f32 %v1226_v19, %v786_v30  ;;  %v1307_v33 = vpop.f32.mrb[3].mxu1  ;;  %v714_v34 = vmul.f32 3.0, %v711_v29 }
 0x19c   : > { %v790_v35 = vmul.f32 3.0, %v787_v32  ;;  %1449 = vtanh.f32 %v714_v34 }
 0x19e   : > { %1451 = vtanh.f32 %v790_v35  ;;  %v1446_v36 = vpop.eup %1445 }
 0x19f   : > { %1314 = vmatpush3.xpose.msk.msra.mxu1 %vm482_vm1, %v1446_v36 }
 0x1a0   : > { %v1448_v37 = vpop.eup %1447 }
 0x1a1   : > { %1309 = vmatpush3.xpose.msk.msra.mxu0 %vm482_vm1, %v1448_v37 }
 0x1a6   : > { %v1450_v38 = vpop.eup %1449 }
 0x1a7   : > { %1311 = vmatmul.mubr.msk.f32.vlgmr.msra.gmra.mrb[4].mxu0 %vm482_vm1, %v1450_v38 }
 0x1a8   : > { %v1452_v39 = vpop.eup %1451 }
 0x1a9   : > { %1316 = vmatmul.mubr.msk.f32.vlgmr.msra.gmra.mrb[4].mxu1 %vm482_vm1, %v1452_v39 }
 0x27a   : > { %v864_v40 = vpop.f32.mrb[4].mxu0 }
 0x27b   : > { %v1312_v42 = vpop.f32.mrb[5].mxu0 }
 0x27c   : > { %v940_v41 = vpop.f32.mrb[4].mxu1 }
 0x27d   : > { %v944_v43 = vsub.f32 %v864_v40, %v940_v41  ;;  %v1317_v44 = vpop.f32.mrb[5].mxu1 }
 0x27f   : > { %v945_v45 = vmul.f32 3.0, %v944_v43 }
 0x281   : > { %1453 = vtanh.f32 %v945_v45 }
 0x28b   : > { %v1454_v46 = vpop.eup %1453 }
 0x28c   : > { %v2035_v47 = vmax.f32 %v1454_v46, 0.0 }
 0x28e   : > { %v951_v48 = vsel %vm950_vm2, %v2035_v47, -inf }
 0x28f   : > { %952 = vmax.xlane.f32.xlu0 %v951_v48 }
 0x31c   : > { %v953_v51 = vpop.xlane.xlu0 %952 }
 0x31d   : > { %vm954_vm3 = vcmp.eq.f32.partialorder %v2035_v47, %v953_v51 }
 0x31e   : > { %v955_v52 = vsel %vm954_vm3, %v2039_v50, 8 }
 0x31f   : > { %v956_v53 = vsel %vm950_vm2, %v955_v52, 2147483647 }
 0x320   : > { %v958_v54 = vshra.s32 %v956_v53, 16  ;;  %v957_v56 = vand.u32 65535, %v956_v53 }
 0x322   : > { %v960_v55 = vcvt.s32.f32 %v958_v54  ;;  %v959_v58 = vcvt.s32.f32 %v957_v56 }
 0x324   : > { %961 = vmin.xlane.f32.xlu0 %v960_v55 }
 0x3b1   : > { %v962_v57 = vpop.xlane.xlu0 %961 }
 0x3b2   : > { %vm963_vm4 = vcmp.eq.f32.partialorder %v960_v55, %v962_v57  ;;  %v968_v60 = vcvt.f32.s32 %v962_v57 }
 0x3b3   : > { %v964_v59 = vsel %vm963_vm4, %v959_v58, inf }
 0x3b4   : > { %965 = vmin.xlane.f32.xlu1 %v964_v59  ;;  %v969_v62 = vshll.u32 %v968_v60, 16 }
 0x441   : > { %v966_v61 = vpop.xlane.xlu1 %965 }
 0x442   : > { %v967_v63 = vcvt.f32.s32 %v966_v61 }
 0x444   : > { %v970_v0 = vadd.s32 %v969_v62, %v967_v63 }
 0x446   : > { %vm971_vm5 = vcmp.eq.s32.totalorder %v2039_v50, %v970_v0 }
 0x447   : > { %v974_v1 = vsel %vm971_vm5, -inf, %v2035_v47  ;;  %v972_v17 = vsel %vm971_vm5, %v2035_v47, 0.0 }
 0x448   : > { %v975_v2 = vsel %vm950_vm2, %v974_v1, -inf }
 0x449   : > { %976 = vmax.xlane.f32.xlu1 %v975_v2 }
 0x4d6   : > { %v977_v3 = vpop.xlane.xlu1 %976 }
 0x4d7   : > { %vm978_vm6 = vcmp.eq.f32.partialorder %v974_v1, %v977_v3 }
 0x4d8   : > { %v979_v4 = vsel %vm978_vm6, %v2039_v50, 8 }
 0x4d9   : > { %v980_v5 = vsel %vm950_vm2, %v979_v4, 2147483647 }
 0x4da   : > { %v982_v6 = vshra.s32 %v980_v5, 16  ;;  %v981_v8 = vand.u32 65535, %v980_v5 }
 0x4dc   : > { %v984_v7 = vcvt.s32.f32 %v982_v6  ;;  %v983_v10 = vcvt.s32.f32 %v981_v8 }
 0x4de   : > { %985 = vmin.xlane.f32.xlu0 %v984_v7 }
 0x56b   : > { %v986_v9 = vpop.xlane.xlu0 %985 }
 0x56c   : > { %vm987_vm7 = vcmp.eq.f32.partialorder %v984_v7, %v986_v9  ;;  %v992_v12 = vcvt.f32.s32 %v986_v9 }
 0x56d   : > { %v988_v11 = vsel %vm987_vm7, %v983_v10, inf }
 0x56e   : > { %989 = vmin.xlane.f32.xlu1 %v988_v11  ;;  %v993_v14 = vshll.u32 %v992_v12, 16 }
 0x5fb   : > { %v990_v13 = vpop.xlane.xlu1 %989 }
 0x5fc   : > { %v991_v15 = vcvt.f32.s32 %v990_v13 }
 0x5fe   : > { %v994_v16 = vadd.s32 %v993_v14, %v991_v15 }
 0x600   : > { %vm995_vm8 = vcmp.eq.s32.totalorder %v2039_v50, %v994_v16 }
 0x601   : > { %v998_v18 = vsel %vm995_vm8, -inf, %v974_v1  ;;  %v996_v19 = vsel %vm995_vm8, %v2035_v47, 0.0 }
 0x602   : > { %v999_v20 = vsel %vm950_vm2, %v998_v18, -inf  ;;  %v997_v21 = vadd.f32 %v996_v19, %v972_v17 }
 0x603   : > { %1000 = vmax.xlane.f32.xlu0 %v999_v20 }
 0x690   : > { %v1001_v22 = vpop.xlane.xlu0 %1000 }
 0x691   : > { %vm1002_vm9 = vcmp.eq.f32.partialorder %v998_v18, %v1001_v22 }
 0x692   : > { %v1003_v23 = vsel %vm1002_vm9, %v2039_v50, 8 }
 0x693   : > { %v1004_v24 = vsel %vm950_vm2, %v1003_v23, 2147483647 }
 0x694   : > { %v1006_v25 = vshra.s32 %v1004_v24, 16  ;;  %v1005_v27 = vand.u32 65535, %v1004_v24 }
 0x696   : > { %v1008_v26 = vcvt.s32.f32 %v1006_v25  ;;  %v1007_v29 = vcvt.s32.f32 %v1005_v27 }
 0x698   : > { %1009 = vmin.xlane.f32.xlu1 %v1008_v26 }
 0x725   : > { %v1010_v28 = vpop.xlane.xlu1 %1009 }
 0x726   : > { %vm1011_vm10 = vcmp.eq.f32.partialorder %v1008_v26, %v1010_v28  ;;  %v1016_v31 = vcvt.f32.s32 %v1010_v28 }
 0x727   : > { %v1012_v30 = vsel %vm1011_vm10, %v1007_v29, inf }
 0x728   : > { %1013 = vmin.xlane.f32.xlu0 %v1012_v30  ;;  %v1017_v33 = vshll.u32 %v1016_v31, 16 }
 0x7b5   : > { %v1014_v32 = vpop.xlane.xlu0 %1013 }
 0x7b6   : > { %v1015_v34 = vcvt.f32.s32 %v1014_v32 }
 0x7b8   : > { %v1018_v35 = vadd.s32 %v1017_v33, %v1015_v34 }
 0x7ba   : > { %vm1019_vm11 = vcmp.eq.s32.totalorder %v2039_v50, %v1018_v35 }
 0x7bb   : > { %v1020_v36 = vsel %vm1019_vm11, %v2035_v47, 0.0 }
 0x7bc   : > { %v1021_v37 = vadd.f32 %v1020_v36, %v997_v21 }
 0x7be   : > { %1022 = vst.msk [vmem:[%s454_s22] sm:$0xff] %vm950_vm2, %v1021_v37 }
 0x7bf   : > { %1612 = shalt.err (!%p1609_p7)
}
 0x7c0   : > { %s1613_s4 = scalar_lea.hbm %s2066_s15, 128  ;;  %s1617_s20 = scalar_lea.hbm %s2182_s16, 256 }
 0x7c1   : > { %p1614_p5 = scmp.ne.s32.totalorder %s2066_s15, %s1613_s4  ;;  %p1618_p4 = scmp.lt.u32.totalorder %s2066_s15, %s2182_s16 }
 0x7c2   : > { %p1619_p3 = scmp.lt.u32.totalorder %s1617_s20, %s1613_s4  ;;  %p1621_p6 = scmp.lt.u32.totalorder %s1613_s4, %s2066_s15 }
 0x7c3   : > { %p1615_p10 = pnand %p1614_p5, %p2183_p13 }
 0x7c4   : > { %p1620_p11 = por %p1619_p3, %p1618_p4 }
 0x7c5   : > { %p1616_p2 = pneg %p1615_p10 }
 0x7c6   : > { %p1622_p0 = por %p1621_p6, %p1620_p11 }
 0x7c8   : > { %p1623_p1 = pnand %p1622_p0, %p1616_p2 }
 0x7ca   : > { %1626 = shalt.err (!%p1623_p1)
}
 0x7cb   : > { %1358 = dma.vmem_to_hbm [thread:$0]  (%p2183_p13), %s2068_s1, 128, %s2066_s15, %s1024_s30  }
 0x7cc PF: > { %s2184_s25 = sld [smem:[#allocation16_spill]]  ;;  %s2185_s12 = sld [smem:[#allocation19_spill]] }
 0x7cd   : > { %s2186_s8 = sld [smem:[#allocation18_spill]] }
 0x7d2   : > { %s1050_s5 = sand.u32 1, %s2184_s25   ;;  %p2187_p8 = scmp.ne.s32.totalorder %s2185_s12, 0 }
 0x7d3   : > { %p2188_p9 = scmp.ge.s32.totalorder %s2186_s8, 2  ;;  %s1051_s18 = scalar_lea.sflag [#allocation4], %s1050_s5 }
 0x7d5   : > { %p1378_p12 = pnand %p2188_p9, %p2187_p8 }
 0x7d7   : > { %1664 = dma.done.wait (!%p1378_p12), %s1051_s18, 128  }
 0x7d8   : > { %1666 = vsyncadd (!%p1378_p12), %s1051_s18, 4294967168  ;;  %s26_s10 = sadd.s32 1, %s2186_s8   ;;  %s2189_s7 = sld [smem:[#allocation17_spill]] }
 0x7d9   : > { %p23_p7 = scmp.ge.s32.totalorder %s26_s10, 4   ;;  %s2190_s29 = sld [smem:[#allocation22_spill]] }
 0x7da   : > { %s2191_s14 = sld [smem:[#allocation20_spill]]  ;;  %s2192_s27 = smov %s1673_s28 }
 0x7db   : > { %s2194_s30 = smov %s1685_s9  ;;  %25 = sbr.rel (!%p23_p7) target bundleno = 14 (0xe), region = 131 }
 0x7de   : > { %s2193_s28 = smov %s2189_s7 }
 0x7e0   : > { %s2195_s9 = smov %s2191_s14 }
 0x7e2   :  { %1056 = vsyncpa [#allocation3], 1 }
 0x7e3   :  { %1058 = vsyncpa [#allocation3 + $0x1], 1 }
 0x7e4   :  { %1059 = vsyncpa [#allocation6], 1 }
 0x7e5   :  { %1060 = vsyncpa [#allocation9], 1 }
 0x7e6   :  { %1062 = vsyncpa [#allocation9 + $0x1], 1 }
 0x7e7   :  { %1063 = vsyncpa [#allocation4], 1 }
 0x7e8   :  { %1065 = vsyncpa [#allocation4 + $0x1], 1 }

</bundles_post_ra>
